<compile_context>
chip_gen: v7x
topology: tpu7x:2x2x1
jax: 0.10.0
libtpu: 0.0.40
codegen_flags: <defaults>
</compile_context>

<pallas_src>
import functools

import numpy as np
import jax
import jax.numpy as jnp
from jax.experimental import pallas as pl
from jax.experimental.pallas import tpu as pltpu


# ---------------------------------------------------------------------------
# Small helpers
# ---------------------------------------------------------------------------
def _round_up(x, m):
    return ((x + m - 1) // m) * m


def _cdiv(a, b):
    return (a + b - 1) // b


def _pick_tile(size, max_tile, align):
    """Aligned tile <= ~max_tile that minimizes padding waste for `size`."""
    size_a = _round_up(max(size, align), align)
    if size_a <= max_tile:
        return size_a
    n_blocks = _cdiv(size_a, max_tile)
    return _round_up(_cdiv(size_a, n_blocks), align)


def _pad_to(a, shape, dtype):
    a = a.astype(dtype)
    pads = tuple((0, t - s) for s, t in zip(a.shape, shape))
    if any(p for _, p in pads):          # elide no-op pads (hot-path hygiene)
        a = jnp.pad(a, pads)
    return a


def _stable_softplus(x):
    # log(1 + exp(x)) without overflow for large x (matches torch semantics).
    return jnp.maximum(x, 0.0) + jnp.log(1.0 + jnp.exp(-jnp.abs(x)))


def _plan_tiles(batch, d_in, d_out, max_tm, max_tn, max_tk):
    """Pick (tm, tn, tk), padded sizes and the fold-sigma decision."""
    if max_tk is None:
        k_goal = _round_up(d_in, 128)
        max_tk = k_goal if k_goal <= 2048 else 1024
    tm = _pick_tile(batch, max_tm, 8)
    tn = _pick_tile(d_out, max_tn, 128)
    tk = _pick_tile(d_in, max_tk, 128)
    bp = _round_up(batch, tm)
    np_ = _round_up(d_out, tn)
    kp = _round_up(d_in, tk)

    # v7x megacore: make sure at least one *parallel* (output) grid axis has
    # >= 2 blocks so both TensorCores get work.  Prefer splitting N, which
    # keeps each weight element fetched exactly once when bp//tm == 1.
    if bp // tm == 1 and np_ // tn == 1:
        n_goal = _round_up(d_out, 128)
        b_goal = _round_up(batch, 8)
        if n_goal >= 256:
            tn = _pick_tile(d_out, max(128, (n_goal + 1) // 2), 128)
            np_ = _round_up(d_out, tn)
        elif b_goal >= 16:
            tm = _pick_tile(batch, max(8, (b_goal + 1) // 2), 8)
            bp = _round_up(batch, tm)

    fold_sigma = (bp // tm == 1)      # each rho tile visited exactly once
    return tm, tn, tk, bp, np_, kp, fold_sigma


# ---------------------------------------------------------------------------
# Kernel 1 (only when batch needs >1 M tile):
#   sigma_beta^2 = softplus(rho_beta)^2, stored as bf16
# ---------------------------------------------------------------------------
def _sigma_sq_kernel(rho_ref, out_ref):
    s = _stable_softplus(rho_ref[...])
    out_ref[...] = (s * s).astype(out_ref.dtype)


def _sigma_sq(rho_padded, tk, tn):
    kp, np_ = rho_padded.shape
    return pl.pallas_call(
        _sigma_sq_kernel,
        out_shape=jax.ShapeDtypeStruct((kp, np_), jnp.bfloat16),
        grid=(kp // tk, np_ // tn),
        in_specs=[pl.BlockSpec((tk, tn), lambda i, j: (i, j))],
        out_specs=pl.BlockSpec((tk, tn), lambda i, j: (i, j)),
        compiler_params=pltpu.CompilerParams(
            dimension_semantics=("parallel", "parallel")),
    )(rho_padded)


# ---------------------------------------------------------------------------
# Kernel 2: KL divergence over the weight matrices (tiled; fits any VMEM).
# Padded elements are masked out, so padding never corrupts the sum.
# ---------------------------------------------------------------------------
def _kl_weights_kernel(mu_ref, rho_ref, kl_ref, *, sigma, rows, cols, tk, tn):
    i = pl.program_id(0)
    j = pl.program_id(1)

    @pl.when((i == 0) & (j == 0))
    def _():
        kl_ref[0, 0] = jnp.float32(0.0)

    mu = mu_ref[...]
    rho = rho_ref[...]
    s = _stable_softplus(rho)
    inv_2s2 = 1.0 / (2.0 * sigma * sigma)
    term = ((s * s + mu * mu) * inv_2s2
            - jnp.log(s + 1e-07) + float(np.log(sigma)) - 0.5)

    row_ids = jax.lax.broadcasted_iota(jnp.int32, (tk, tn), 0) + i * tk
    col_ids = jax.lax.broadcasted_iota(jnp.int32, (tk, tn), 1) + j * tn
    mask = (row_ids < rows) & (col_ids < cols)
    kl_ref[0, 0] += jnp.sum(jnp.where(mask, term, 0.0))


def _kl_divergence(mu_beta, rho_beta, mu_bias, rho_bias, sigma):
    f32 = jnp.float32
    d_in, d_out = mu_beta.shape
    tk = _pick_tile(d_in, 256, 8)
    tn = _pick_tile(d_out, 256, 128)
    kp, np_ = _round_up(d_in, tk), _round_up(d_out, tn)
    mu_p = _pad_to(mu_beta, (kp, np_), f32)
    rho_p = _pad_to(rho_beta, (kp, np_), f32)

    kl_w = pl.pallas_call(
        functools.partial(_kl_weights_kernel, sigma=float(sigma),
                          rows=d_in, cols=d_out, tk=tk, tn=tn),
        out_shape=jax.ShapeDtypeStruct((1, 1), f32),
        grid=(kp // tk, np_ // tn),
        in_specs=[pl.BlockSpec((tk, tn), lambda i, j: (i, j)),
                  pl.BlockSpec((tk, tn), lambda i, j: (i, j))],
        out_specs=pl.BlockSpec(memory_space=pltpu.MemorySpace.SMEM),
        compiler_params=pltpu.CompilerParams(
            dimension_semantics=("arbitrary", "arbitrary")),
    )(mu_p, rho_p)[0, 0]

    # Bias KL is O(d_out) parameter-only work: plain XLA is fine.
    s_b = _stable_softplus(rho_bias.astype(f32))
    inv_2s2 = 1.0 / (2.0 * sigma * sigma)
    kl_b = jnp.sum((s_b * s_b + mu_bias.astype(f32) ** 2) * inv_2s2
                   - jnp.log(s_b + 1e-07) + float(np.log(sigma)) - 0.5)
    return kl_w + kl_b


# ---------------------------------------------------------------------------
# Kernel 3: forward hot path
#   out = x @ mu + b_mu + sqrt(x^2 @ sigma^2 + b_sigma^2) * eps
# ---------------------------------------------------------------------------
def _meanfield_kernel(x_ref, mu_ref, w2_ref, mu_bias_ref, sig2_bias_ref,
                      eps_ref, out_ref, var_acc, *, fold_sigma):
    k = pl.program_id(2)

    @pl.when(k == 0)
    def _():
        out_ref[...] = jnp.zeros_like(out_ref)
        var_acc[...] = jnp.zeros_like(var_acc)

    xs = x_ref[...]                                         # bf16, loaded once
    # Mean path accumulates straight into the resident f32 output block
    # (block index constant across k) -> no separate mean scratch.
    out_ref[...] += jnp.dot(xs, mu_ref[...],
                            preferred_element_type=jnp.float32)

    if fold_sigma:
        # softplus(rho)^2 in-kernel: EUP work hidden under the MXU-bound loop,
        # each rho tile visited exactly once (bp//tm == 1).
        s = _stable_softplus(w2_ref[...].astype(jnp.float32))
        sig2 = (s * s).astype(jnp.bfloat16)
    else:
        sig2 = w2_ref[...]                                  # precomputed bf16
    xf = xs.astype(jnp.float32)
    xsq = (xf * xf).astype(jnp.bfloat16)                    # VPU, co-issues
    var_acc[...] += jnp.dot(xsq, sig2, preferred_element_type=jnp.float32)

    @pl.when(k == pl.num_programs(2) - 1)
    def _():
        sigma_out = jnp.sqrt(var_acc[...] + sig2_bias_ref[...])
        out_ref[...] = (out_ref[...] + mu_bias_ref[...]
                        + sigma_out * eps_ref[...]).astype(out_ref.dtype)


def meanfield_forward(x, mu_beta, rho_beta, mu_bias, rho_bias, epsilon, *,
                      sigma=0.6, max_tm=512, max_tn=256, max_tk=None):
    """Returns (output [B, d_out], KL scalar). epsilon=0 gives the eval branch."""
    f32, bf16 = jnp.float32, jnp.bfloat16
    B, d_in = x.shape
    d_out = mu_beta.shape[1]

    tm, tn, tk, bp, np_, kp, fold_sigma = _plan_tiles(
        B, d_in, d_out, max_tm, max_tn, max_tk)

    # bf16 operand streams (MXU inputs); accumulation stays f32.
    # NOTE: in a training loop, cache these padded/cast parameter copies
    # across calls -- they only change at optimizer steps.
    x_p = _pad_to(x, (bp, kp), bf16)
    mu_p = _pad_to(mu_beta, (kp, np_), bf16)
    if fold_sigma:
        w2_p = _pad_to(rho_beta, (kp, np_), bf16)           # rho, folded
    else:
        w2_p = _sigma_sq(_pad_to(rho_beta, (kp, np_), f32), tk, tn)

    mu_bias_p = _pad_to(mu_bias.reshape(1, -1), (1, np_), f32)
    s_bias = _stable_softplus(rho_bias.astype(f32))
    sig2_bias_p = _pad_to((s_bias * s_bias).reshape(1, -1), (1, np_), f32)
    eps_p = _pad_to(epsilon, (bp, np_), f32)

    # Raise the scoped-VMEM limit only if the double-buffered working set
    # exceeds the conservative 16 MiB default (v5e).
    step_bytes = (2 * (tm * tk * 2 + 2 * tk * tn * 2 + 2 * tn * 4
                       + tm * tn * 4)          # double-buffered inputs
                  + 2 * tm * tn * 4            # output block
                  + tm * tn * 4)               # variance scratch
    vmem_limit = None
    if step_bytes > 14 * 1024 * 1024:
        vmem_limit = min(int(step_bytes * 2), 64 * 1024 * 1024)

    out_p = pl.pallas_call(
        functools.partial(_meanfield_kernel, fold_sigma=fold_sigma),
        out_shape=jax.ShapeDtypeStruct((bp, np_), f32),
        grid=(bp // tm, np_ // tn, kp // tk),
        in_specs=[
            pl.BlockSpec((tm, tk), lambda i, j, k: (i, k)),   # x (bf16)
            pl.BlockSpec((tk, tn), lambda i, j, k: (k, j)),   # mu_beta (bf16)
            pl.BlockSpec((tk, tn), lambda i, j, k: (k, j)),   # rho / sigma^2
            pl.BlockSpec((1, tn), lambda i, j, k: (0, j)),    # mu_bias
            pl.BlockSpec((1, tn), lambda i, j, k: (0, j)),    # sigma_bias^2
            pl.BlockSpec((tm, tn), lambda i, j, k: (i, j)),   # epsilon
        ],
        out_specs=pl.BlockSpec((tm, tn), lambda i, j, k: (i, j)),
        scratch_shapes=[pltpu.VMEM((tm, tn), f32)],           # variance acc
        compiler_params=pltpu.CompilerParams(
            dimension_semantics=("parallel", "parallel", "arbitrary"),
            vmem_limit_bytes=vmem_limit),
    )(x_p, mu_p, w2_p, mu_bias_p, sig2_bias_p, eps_p)

    out = out_p[:B, :d_out]
    kl = _kl_divergence(mu_beta, rho_beta, mu_bias, rho_bias, sigma)
    return out, kl


# ---------------------------------------------------------------------------
# References
# ---------------------------------------------------------------------------
def _reference(x, mu_beta, rho_beta, mu_bias, rho_bias, epsilon, sigma=0.6):
    tiny = 1e-07
    sigma_beta = jnp.log(1.0 + jnp.exp(rho_beta))
    sigma_bias = jnp.log(1.0 + jnp.exp(rho_bias))
    mean_output = x @ mu_beta + mu_bias
    sigma_output = jnp.sqrt((x ** 2) @ (sigma_beta ** 2) + sigma_bias ** 2)
    output = mean_output + sigma_output * epsilon
    kl_beta = jnp.sum((sigma_beta ** 2 + mu_beta ** 2) / (2 * sigma ** 2)
                      - jnp.log(sigma_beta + tiny) + np.log(sigma) - 0.5)
    kl_bias = jnp.sum((sigma_bias ** 2 + mu_bias ** 2) / (2 * sigma ** 2)
                      - jnp.log(sigma_bias + tiny) + np.log(sigma) - 0.5)
    return output, kl_beta + kl_bias


def _mirrored_reference(x, mu_beta, rho_beta, mu_bias, rho_bias, epsilon,
                        rho_in_bf16):
    # Mirrors the kernel's bf16 MXU operand rounding (f32 accumulation) so the
    # comparison can be tight.
    f32, bf16 = jnp.float32, jnp.bfloat16
    xb = x.astype(bf16).astype(f32)
    mub = mu_beta.astype(bf16).astype(f32)
    rho = rho_beta.astype(bf16).astype(f32) if rho_in_bf16 else rho_beta.astype(f32)
    s = _stable_softplus(rho)
    sig2 = (s * s).astype(bf16).astype(f32)
    xsq = (xb * xb).astype(bf16).astype(f32)
    s_bias = _stable_softplus(rho_bias.astype(f32))
    mean = xb @ mub + mu_bias
    var = xsq @ sig2 + s_bias ** 2
    return mean + jnp.sqrt(var) * epsilon


# ---------------------------------------------------------------------------
# Demo / correctness checks
# ---------------------------------------------------------------------------
if __name__ == "__main__":
    sigma = 0.6

    def make_inputs(input_dim, output_dim, batch, seed=0):
        scale = float(np.sqrt(6.0 / (input_dim + output_dim)))
        key = jax.random.PRNGKey(seed)
        k1, k2, k3, k4, k5, k6 = jax.random.split(key, 6)
        mu_beta = jax.random.uniform(k1, (input_dim, output_dim), jnp.float32,
                                     -scale, scale)
        rho_beta = jax.random.uniform(k2, (input_dim, output_dim), jnp.float32,
                                      -4.0, -2.0)
        mu_bias = jax.random.uniform(k3, (output_dim,), jnp.float32,
                                     -scale, scale)
        rho_bias = jax.random.uniform(k4, (output_dim,), jnp.float32,
                                      -4.0, -2.0)
        x = jax.random.normal(k5, (batch, input_dim), jnp.float32)
        epsilon = jax.random.normal(k6, (batch, output_dim), jnp.float32)
        return x, mu_beta, rho_beta, mu_bias, rho_bias, epsilon

    def check_case(input_dim, output_dim, batch, **tile_kw):
        x, mu_b, rho_b, mu_bi, rho_bi, eps = make_inputs(
            input_dim, output_dim, batch)
        *_, fold = _plan_tiles(batch, input_dim, output_dim,
                               tile_kw.get("max_tm", 512),
                               tile_kw.get("max_tn", 256),
                               tile_kw.get("max_tk", None))
        out, kl = meanfield_forward(x, mu_b, rho_b, mu_bi, rho_bi, eps,
                                    sigma=sigma, **tile_kw)
        jax.block_until_ready((out, kl))

        out_mirror = _mirrored_reference(x, mu_b, rho_b, mu_bi, rho_bi, eps,
                                         rho_in_bf16=fold)
        ref_out, ref_kl = _reference(x, mu_b, rho_b, mu_bi, rho_bi, eps, sigma)

        assert out.shape == (batch, output_dim)
        assert jnp.allclose(out, out_mirror, atol=2e-3, rtol=2e-3)
        assert jnp.allclose(out, ref_out, atol=5e-2, rtol=5e-2)
        assert jnp.allclose(kl, ref_kl, atol=1e-2, rtol=5e-4)
        return x, mu_b, rho_b, mu_bi, rho_bi, kl

    # Case 1: tiny layer (matches the PyTorch module scale); fold path,
    # single (i, j, k) grid point.
    x1, mu1, rho1, mub1, rhob1, kl1 = check_case(32, 16, 8)

    # Eval branch (training=False): epsilon = 0 reproduces the deterministic
    # output; the KL is independent of epsilon.
    out_eval, kl_eval = meanfield_forward(
        x1, mu1, rho1, mub1, rhob1,
        jnp.zeros((8, 16), jnp.float32), sigma=sigma)
    jax.block_until_ready((out_eval, kl_eval))
    mean_mirror = (x1.astype(jnp.bfloat16).astype(jnp.float32)
                   @ mu1.astype(jnp.bfloat16).astype(jnp.float32) + mub1)
    assert jnp.allclose(out_eval, mean_mirror, atol=1e-3, rtol=1e-3)
    assert jnp.allclose(kl_eval, kl1)

    # Case 2: medium layer with default tiles -> exercises the v7x
    # "split an output axis for 2 TensorCores" logic (fold path, 2 j-blocks).
    check_case(384, 256, 48)

    # Case 3: same layer with forced small tiles -> multi i/j/k blocks and the
    # non-folded path (separate bf16 sigma^2 precompute kernel).
    check_case(384, 256, 48, max_tm=16, max_tn=128, max_tk=128)

    print("KERNEL_OK")
</pallas_src>

<mosaic_0001>
module attributes {stable_mosaic.version = 11 : i64} {
  func.func @_meanfield_kernel(%arg0: i32, %arg1: i32, %arg2: i32, %arg3: memref<8x128xbf16, #tpu.memory_space<vmem>>, %arg4: memref<128x128xbf16, #tpu.memory_space<vmem>>, %arg5: memref<128x128xbf16, #tpu.memory_space<vmem>>, %arg6: memref<1x128xf32, #tpu.memory_space<vmem>>, %arg7: memref<1x128xf32, #tpu.memory_space<vmem>>, %arg8: memref<8x128xf32, #tpu.memory_space<vmem>>, %arg9: memref<8x128xf32, #tpu.memory_space<vmem>>, %arg10: memref<8x128xf32, #tpu.memory_space<vmem>>) attributes {dimension_semantics = [#tpu.dimension_semantics<parallel>, #tpu.dimension_semantics<parallel>, #tpu.dimension_semantics<arbitrary>], iteration_bounds = array<i64: 1, 1, 1>, scalar_prefetch = 0 : i64, scratch_operands = 1 : i64, tpu.core_type = #tpu.core_type<tc>, window_params = [{transform_indices = @transform_0, window_bounds = array<i64: 8, 128>}, {transform_indices = @transform_1, window_bounds = array<i64: 128, 128>}, {transform_indices = @transform_2, window_bounds = array<i64: 128, 128>}, {transform_indices = @transform_3, window_bounds = array<i64: 1, 128>}, {transform_indices = @transform_4, window_bounds = array<i64: 1, 128>}, {transform_indices = @transform_5, window_bounds = array<i64: 8, 128>}, {transform_indices = @transform_6, window_bounds = array<i64: 8, 128>}]} {
    %c0_i32 = arith.constant 0 : i32
    %0 = arith.cmpi eq, %arg2, %c0_i32 : i32
    %1 = arith.extui %0 : i1 to i32
    %c0_i32_0 = arith.constant 0 : i32
    %2 = arith.cmpi ne, %1, %c0_i32_0 : i32
    scf.if %2 {
      %cst_20 = arith.constant 0.000000e+00 : f32
      %33 = vector.broadcast %cst_20 : f32 to vector<8x128xf32>
      %c0_21 = arith.constant 0 : index
      %c0_22 = arith.constant 0 : index
      %34 = vector.load %arg9[%c0_21, %c0_22] : memref<8x128xf32, #tpu.memory_space<vmem>>, vector<8x128xf32>
      tpu.vector_store %arg9[%c0_21, %c0_22], %33 {strides = array<i32>} : memref<8x128xf32, #tpu.memory_space<vmem>>, vector<8x128xf32>,
      %cst_23 = arith.constant 0.000000e+00 : f32
      %35 = vector.broadcast %cst_23 : f32 to vector<8x128xf32>
      %c0_24 = arith.constant 0 : index
      %c0_25 = arith.constant 0 : index
      %36 = vector.load %arg10[%c0_24, %c0_25] : memref<8x128xf32, #tpu.memory_space<vmem>>, vector<8x128xf32>
      tpu.vector_store %arg10[%c0_24, %c0_25], %35 {strides = array<i32>} : memref<8x128xf32, #tpu.memory_space<vmem>>, vector<8x128xf32>,
    } else {
    }
    %c0 = arith.constant 0 : index
    %c0_1 = arith.constant 0 : index
    %3 = vector.load %arg3[%c0, %c0_1] : memref<8x128xbf16, #tpu.memory_space<vmem>>, vector<8x128xbf16>
    %c0_2 = arith.constant 0 : index
    %c0_3 = arith.constant 0 : index
    %4 = vector.load %arg9[%c0_2, %c0_3] : memref<8x128xf32, #tpu.memory_space<vmem>>, vector<8x128xf32>
    %c0_4 = arith.constant 0 : index
    %c0_5 = arith.constant 0 : index
    %5 = vector.load %arg4[%c0_4, %c0_5] : memref<128x128xbf16, #tpu.memory_space<vmem>>, vector<128x128xbf16>
    %cst = arith.constant dense<0.000000e+00> : vector<8x128xf32>
    %6 = tpu.matmul %3, %5, %cst {dimension_numbers = #tpu.dot_dimension_numbers<[1], [0], [0], [1], [0, 0, 1, 1], [], []>} : vector<8x128xbf16>, vector<128x128xbf16>, vector<8x128xf32> -> vector<8x128xf32>
    %7 = arith.addf %4, %6 : vector<8x128xf32>
    %c0_6 = arith.constant 0 : index
    %c0_7 = arith.constant 0 : index
    %8 = vector.load %arg9[%c0_6, %c0_7] : memref<8x128xf32, #tpu.memory_space<vmem>>, vector<8x128xf32>
    tpu.vector_store %arg9[%c0_6, %c0_7], %7 {strides = array<i32>} : memref<8x128xf32, #tpu.memory_space<vmem>>, vector<8x128xf32>,
    %c0_8 = arith.constant 0 : index
    %c0_9 = arith.constant 0 : index
    %9 = vector.load %arg5[%c0_8, %c0_9] : memref<128x128xbf16, #tpu.memory_space<vmem>>, vector<128x128xbf16>
    %10 = arith.extf %9 : vector<128x128xbf16> to vector<128x128xf32>
    %cst_10 = arith.constant 0.000000e+00 : f32
    %11 = vector.broadcast %cst_10 : f32 to vector<128x128xf32>
    %12 = arith.maximumf %10, %11 : vector<128x128xf32>
    %13 = math.absf %10 : vector<128x128xf32>
    %cst_11 = arith.constant 0.000000e+00 : f32
    %14 = vector.broadcast %cst_11 : f32 to vector<128x128xf32>
    %15 = arith.subf %14, %13 : vector<128x128xf32>
    %16 = math.exp %15 : vector<128x128xf32>
    %cst_12 = arith.constant 1.000000e+00 : f32
    %17 = vector.broadcast %cst_12 : f32 to vector<128x128xf32>
    %18 = arith.addf %17, %16 : vector<128x128xf32>
    %19 = math.log %18 : vector<128x128xf32>
    %20 = arith.addf %12, %19 : vector<128x128xf32>
    %21 = arith.mulf %20, %20 : vector<128x128xf32>
    %22 = arith.truncf %21 : vector<128x128xf32> to vector<128x128xbf16>
    %23 = arith.extf %3 : vector<8x128xbf16> to vector<8x128xf32>
    %24 = arith.mulf %23, %23 : vector<8x128xf32>
    %25 = arith.truncf %24 : vector<8x128xf32> to vector<8x128xbf16>
    %c0_13 = arith.constant 0 : index
    %c0_14 = arith.constant 0 : index
    %26 = vector.load %arg10[%c0_13, %c0_14] : memref<8x128xf32, #tpu.memory_space<vmem>>, vector<8x128xf32>
    %cst_15 = arith.constant dense<0.000000e+00> : vector<8x128xf32>
    %27 = tpu.matmul %25, %22, %cst_15 {dimension_numbers = #tpu.dot_dimension_numbers<[1], [0], [0], [1], [0, 0, 1, 1], [], []>} : vector<8x128xbf16>, vector<128x128xbf16>, vector<8x128xf32> -> vector<8x128xf32>
    %28 = arith.addf %26, %27 : vector<8x128xf32>
    %c0_16 = arith.constant 0 : index
    %c0_17 = arith.constant 0 : index
    %29 = vector.load %arg10[%c0_16, %c0_17] : memref<8x128xf32, #tpu.memory_space<vmem>>, vector<8x128xf32>
    tpu.vector_store %arg10[%c0_16, %c0_17], %28 {strides = array<i32>} : memref<8x128xf32, #tpu.memory_space<vmem>>, vector<8x128xf32>,
    %c0_i32_18 = arith.constant 0 : i32
    %30 = arith.cmpi eq, %arg2, %c0_i32_18 : i32
    %31 = arith.extui %30 : i1 to i32
    %c0_i32_19 = arith.constant 0 : i32
    %32 = arith.cmpi ne, %31, %c0_i32_19 : i32
    scf.if %32 {
      %c0_20 = arith.constant 0 : index
      %c0_21 = arith.constant 0 : index
      %33 = vector.load %arg10[%c0_20, %c0_21] : memref<8x128xf32, #tpu.memory_space<vmem>>, vector<8x128xf32>
      %c0_22 = arith.constant 0 : index
      %c0_23 = arith.constant 0 : index
      %34 = vector.load %arg7[%c0_22, %c0_23] : memref<1x128xf32, #tpu.memory_space<vmem>>, vector<1x128xf32>
      %35 = vector.broadcast %34 : vector<1x128xf32> to vector<8x128xf32>
      %36 = arith.addf %33, %35 : vector<8x128xf32>
      %37 = math.sqrt %36 : vector<8x128xf32>
      %c0_24 = arith.constant 0 : index
      %c0_25 = arith.constant 0 : index
      %38 = vector.load %arg9[%c0_24, %c0_25] : memref<8x128xf32, #tpu.memory_space<vmem>>, vector<8x128xf32>
      %c0_26 = arith.constant 0 : index
      %c0_27 = arith.constant 0 : index
      %39 = vector.load %arg6[%c0_26, %c0_27] : memref<1x128xf32, #tpu.memory_space<vmem>>, vector<1x128xf32>
      %40 = vector.broadcast %39 : vector<1x128xf32> to vector<8x128xf32>
      %41 = arith.addf %38, %40 : vector<8x128xf32>
      %c0_28 = arith.constant 0 : index
      %c0_29 = arith.constant 0 : index
      %42 = vector.load %arg8[%c0_28, %c0_29] : memref<8x128xf32, #tpu.memory_space<vmem>>, vector<8x128xf32>
      %43 = arith.mulf %37, %42 : vector<8x128xf32>
      %44 = arith.addf %41, %43 : vector<8x128xf32>
      %c0_30 = arith.constant 0 : index
      %c0_31 = arith.constant 0 : index
      %45 = vector.load %arg9[%c0_30, %c0_31] : memref<8x128xf32, #tpu.memory_space<vmem>>, vector<8x128xf32>
      tpu.vector_store %arg9[%c0_30, %c0_31], %44 {strides = array<i32>} : memref<8x128xf32, #tpu.memory_space<vmem>>, vector<8x128xf32>,
    } else {
    }
    return
  }
  func.func @transform_0(%arg0: i32, %arg1: i32, %arg2: i32) -> (i32, i32) {
    %c0_i32 = arith.constant 0 : i32
    return %arg0, %arg2 : i32, i32
  }
  func.func @transform_1(%arg0: i32, %arg1: i32, %arg2: i32) -> (i32, i32) {
    %c0_i32 = arith.constant 0 : i32
    return %arg2, %arg1 : i32, i32
  }
  func.func @transform_2(%arg0: i32, %arg1: i32, %arg2: i32) -> (i32, i32) {
    %c0_i32 = arith.constant 0 : i32
    return %arg2, %arg1 : i32, i32
  }
  func.func @transform_3(%arg0: i32, %arg1: i32, %arg2: i32) -> (i32, i32) {
    %c0_i32 = arith.constant 0 : i32
    %c0_i32_0 = arith.constant 0 : i32
    return %c0_i32, %arg1 : i32, i32
  }
  func.func @transform_4(%arg0: i32, %arg1: i32, %arg2: i32) -> (i32, i32) {
    %c0_i32 = arith.constant 0 : i32
    %c0_i32_0 = arith.constant 0 : i32
    return %c0_i32, %arg1 : i32, i32
  }
  func.func @transform_5(%arg0: i32, %arg1: i32, %arg2: i32) -> (i32, i32) {
    %c0_i32 = arith.constant 0 : i32
    return %arg0, %arg1 : i32, i32
  }
  func.func @transform_6(%arg0: i32, %arg1: i32, %arg2: i32) -> (i32, i32) {
    %c0_i32 = arith.constant 0 : i32
    return %arg0, %arg1 : i32, i32
  }
}

</mosaic_0001>

<bundles_post_ra>
// kernel: tpu_custom_call.1
= control target key start
LH: loop header
LB: loop body
LE: loop exit
PB: predicated region body
PF: predicated region fallthrough
CT: control target
= control target key end

     0   :  { %11 = vsyncpa [#allocation4], 0  ;;  %s979_s0 = inlined_call_operand.hbm [shape: bf16[8,128], index: 0, kind: input, shape index: {}]   ;;  %s980_s1 = inlined_call_operand.hbm [shape: bf16[128,128], index: 1, kind: input, shape index: {}]   ;;  %s981_s2 = inlined_call_operand.hbm [shape: bf16[128,128], index: 2, kind: input, shape index: {}]   ;;  %s982_s3 = inlined_call_operand.vmem [shape: f32[1,128], index: 3, kind: input, shape index: {}]   ;;  %s983_s4 = inlined_call_operand.vmem [shape: f32[1,128], index: 4, kind: input, shape index: {}]   ;;  %s984_s5 = inlined_call_operand.vmem [shape: f32[8,128], index: 5, kind: input, shape index: {}]   ;;  %s985_s6 = inlined_call_operand.hbm [shape: f32[8,128], index: 6, kind: output, shape index: {}]  }
   0x1   :  { %12 = vsyncpa [#allocation7], 0 }
   0x2   :  { %13 = vsyncpa [#allocation5], 0  ;;  %s755_s21 = smov [#allocation6]   ;;  %s661_s25 = scalar_lea.hbm %s980_s1, 1024 }
   0x3   :  { %s29_s22 = sshll.u32 %s755_s21, 4  ;;  %p662_p0 = scmp.ne.s32.totalorder %s980_s1, %s661_s25  ;;  %s30_s22 = int_to_ptr.vmem [resolvable:$true] %s29_s22 }
   0x4   :  { %p665_p1 = scmp.lt.u32.totalorder %s661_s25, %s980_s1 }
   0x6   :  { %p667_p2 = pnand %p665_p1, %p662_p0 }
   0x8   :  { %670 = shalt.err (!%p667_p2)
}
   0x9   :  { %s671_s30 = scalar_lea.vmem %s30_s22, 1024  ;;  %p676_p4 = scmp.lt.s32.totalorder %s30_s22, %s30_s22 }
   0xa   :  { %p672_p3 = scmp.ne.s32.totalorder %s30_s22, %s671_s30  ;;  %p677_p5 = scmp.lt.s32.totalorder %s671_s30, %s671_s30 }
   0xc   :  { %p678_p6 = por %p677_p5, %p676_p4 }
   0xe   :  { %p679_p7 = pnand %p678_p6, %p672_p3 }
  0x10   :  { %682 = shalt.err (!%p679_p7)
}
  0x11   :  { %s756_s7 = smov 64   ;;  %s757_s8 = smov 4  }
  0x12   :  { %35 = dma.hbm_to_vmem [thread:$0]  %s980_s1, 1024, %s30_s22, [#allocation7], %s756_s7, %s756_s7, %s757_s8  }
  0x13   :  { %s758_s11 = smov [#allocation3]   ;;  %s759_s13 = smov [#allocation8]  }
  0x14   :  { %s20_s12 = sshll.u32 %s758_s11, 4  ;;  %s41_s14 = sshll.u32 %s759_s13, 4  ;;  %s21_s12 = int_to_ptr.vmem [resolvable:$true] %s20_s12  ;;  %s42_s14 = int_to_ptr.vmem [resolvable:$true] %s41_s14 }
  0x15   :  { %s683_s17 = scalar_lea.hbm %s979_s0, 64 }
  0x16   :  { %p684_p8 = scmp.ne.s32.totalorder %s979_s0, %s683_s17  ;;  %p687_p9 = scmp.lt.u32.totalorder %s683_s17, %s979_s0 }
  0x18   :  { %p689_p10 = pnand %p687_p9, %p684_p8 }
  0x1a   :  { %692 = shalt.err (!%p689_p10)
}
  0x1b   :  { %s693_s1 = scalar_lea.vmem %s21_s12, 64  ;;  %p698_p12 = scmp.lt.s32.totalorder %s21_s12, %s21_s12 }
  0x1c   :  { %p694_p11 = scmp.ne.s32.totalorder %s21_s12, %s693_s1  ;;  %p699_p13 = scmp.lt.s32.totalorder %s693_s1, %s693_s1 }
  0x1e   :  { %p700_p0 = por %p699_p13, %p698_p12 }
  0x20   :  { %p701_p1 = pnand %p700_p0, %p694_p11 }
  0x22   :  { %704 = shalt.err (!%p701_p1)
}
  0x23   :  { %23 = dma.hbm_to_vmem [thread:$0]  %s979_s0, 64, %s21_s12, [#allocation4]  }
  0x24   :  { %s705_s26 = scalar_lea.hbm %s981_s2, 1024 }
  0x25   :  { %p706_p2 = scmp.ne.s32.totalorder %s981_s2, %s705_s26  ;;  %p709_p3 = scmp.lt.u32.totalorder %s705_s26, %s981_s2 }
  0x27   :  { %p711_p4 = pnand %p709_p3, %p706_p2 }
  0x29   :  { %714 = shalt.err (!%p711_p4)
}
  0x2a   :  { %s715_s9 = scalar_lea.vmem %s42_s14, 1024  ;;  %p720_p6 = scmp.lt.s32.totalorder %s42_s14, %s42_s14 }
  0x2b   :  { %p716_p5 = scmp.ne.s32.totalorder %s42_s14, %s715_s9  ;;  %p721_p7 = scmp.lt.s32.totalorder %s715_s9, %s715_s9 }
  0x2d   :  { %p722_p8 = por %p721_p7, %p720_p6 }
  0x2f   :  { %p723_p9 = pnand %p722_p8, %p716_p5 }
  0x31   :  { %726 = shalt.err (!%p723_p9)
}
  0x32   :  { %47 = dma.hbm_to_vmem [thread:$0]  %s981_s2, 1024, %s42_s14, [#allocation7], %s756_s7, %s756_s7, %s757_s8  }
  0x33   :  { %749 = dma.done.wait [#allocation4], 64  }
  0x34   :  { %750 = vsyncadd [#allocation4], 4294967232 }
  0x35   :  { %751 = dma.done.wait [#allocation7], 2048  }
  0x36   :  { %752 = vsyncadd [#allocation7], 4294965248  ;;  %v760_v0 = vmov 0.0   ;;  %vm761_vm0 = vmmov 0   ;;  %v844_v1 = vld [vmem:[#allocation8] sm:$0xff]   ;;  %v848_v5 = vld [vmem:[#allocation8 + $0x8] sm:$0xff]  }
  0x37   :  { %559 = vmatprep.subr.bf16.mxu1 %v760_v0  ;;  %539 = vmatprep.subr.bf16.mxu0 %v760_v0  ;;  %v484_v2 = vunpack.c.l.bf16 %v844_v1  ;;  %v485_v3 = vunpack.c.h.bf16 %v844_v1  ;;  %v587_v4 = vld [vmem:[#allocation6] sm:$0xff]   ;;  %v488_v6 = vunpack.c.l.bf16 %v848_v5  ;;  %v489_v7 = vunpack.c.h.bf16 %v848_v5  ;;  %v852_v8 = vld [vmem:[#allocation8 + $0x10] sm:$0xff]   ;;  %v588_v11 = vld [vmem:[#allocation6 + $0x8] sm:$0xff]  }
  0x38   :  { %575 = vmatprep.mubr.msk.bf16.mxu1 %vm761_vm0, %v760_v0  ;;  %555 = vmatprep.mubr.msk.bf16.mxu0 %vm761_vm0, %v760_v0  ;;  %v492_v16 = vunpack.c.l.bf16 %v852_v8  ;;  %v493_v17 = vunpack.c.h.bf16 %v852_v8  ;;  %v865_v20 = vld [vmem:[#allocation8 + $0x18] sm:$0xff]   ;;  %v589_v23 = vld [vmem:[#allocation6 + $0x10] sm:$0xff]   ;;  %v874_v30 = vld [vmem:[#allocation8 + $0x20] sm:$0xff]  }
  0x39   :  { %v226_v9 = vand.u32 2147483647, %v484_v2  ;;  %v227_v10 = vand.u32 2147483647, %v485_v3  ;;  %540 = vmatpush3.bf16.msra.mxu0 %v587_v4  ;;  %v228_v12 = vand.u32 2147483647, %v488_v6  ;;  %v496_v27 = vunpack.c.l.bf16 %v865_v20 }
  0x3a   :  { %v229_v13 = vand.u32 2147483647, %v489_v7  ;;  %541 = vmatprep.subr.bf16.mxu0 %v760_v0  ;;  %v230_v26 = vand.u32 2147483647, %v492_v16  ;;  %v231_v28 = vand.u32 2147483647, %v493_v17  ;;  %v497_v29 = vunpack.c.h.bf16 %v865_v20 }
  0x3b   :  { %v242_v14 = vsub.f32 0.0, %v226_v9  ;;  %v243_v15 = vsub.f32 0.0, %v227_v10  ;;  %v244_v18 = vsub.f32 0.0, %v228_v12  ;;  %v232_v32 = vand.u32 2147483647, %v496_v27  ;;  %v590_v35 = vld [vmem:[#allocation6 + $0x18] sm:$0xff]  }
  0x3c   :  { %v245_v19 = vsub.f32 0.0, %v229_v13  ;;  %v246_v31 = vsub.f32 0.0, %v230_v26  ;;  %v247_v33 = vsub.f32 0.0, %v231_v28  ;;  %v233_v34 = vand.u32 2147483647, %v497_v29  ;;  %v882_v39 = vld [vmem:[#allocation8 + $0x28] sm:$0xff]  }
  0x3d   :  { %v258_v21 = vmul.f32 1.442695, %v242_v14  ;;  %v260_v22 = vmul.f32 1.442695, %v243_v15  ;;  %542 = vmatpush3.bf16.msra.mxu0 %v588_v11  ;;  %v262_v24 = vmul.f32 1.442695, %v244_v18  ;;  %v500_v38 = vunpack.c.l.bf16 %v874_v30 }
  0x3e   :  { %v264_v25 = vmul.f32 1.442695, %v245_v19  ;;  %543 = vmatprep.subr.bf16.mxu0 %v760_v0  ;;  %v266_v36 = vmul.f32 1.442695, %v246_v31  ;;  %v248_v37 = vsub.f32 0.0, %v232_v32  ;;  %v249_v41 = vsub.f32 0.0, %v233_v34 }
  0x3f   :  { %595 = vpow2.f32 %v258_v21  ;;  %v268_v40 = vmul.f32 1.442695, %v247_v33  ;;  %v501_v42 = vunpack.c.h.bf16 %v874_v30  ;;  %v504_v43 = vunpack.c.l.bf16 %v882_v39  ;;  %v888_v46 = vld [vmem:[#allocation8 + $0x30] sm:$0xff]   ;;  %v591_v49 = vld [vmem:[#allocation6 + $0x20] sm:$0xff]   ;;  %v592_v60 = vld [vmem:[#allocation6 + $0x28] sm:$0xff]  }
  0x40   :  { %597 = vpow2.f32 %v260_v22  ;;  %v270_v44 = vmul.f32 1.442695, %v248_v37  ;;  %v234_v45 = vand.u32 2147483647, %v500_v38  ;;  %v272_v47 = vmul.f32 1.442695, %v249_v41 }
  0x41   :  { %599 = vpow2.f32 %v262_v24  ;;  %544 = vmatpush3.bf16.msra.mxu0 %v589_v23  ;;  %v235_v48 = vand.u32 2147483647, %v501_v42  ;;  %v505_v51 = vunpack.c.h.bf16 %v882_v39  ;;  %v236_v53 = vand.u32 2147483647, %v504_v43  ;;  %v903_v9 = vld [vmem:[#allocation8 + $0x38] sm:$0xff]   ;;  %v593_v21 = vld [vmem:[#allocation6 + $0x30] sm:$0xff]  }
  0x42   :  { %601 = vpow2.f32 %v264_v25  ;;  %545 = vmatprep.subr.bf16.mxu0 %v760_v0  ;;  %v250_v50 = vsub.f32 0.0, %v234_v45  ;;  %v508_v54 = vunpack.c.l.bf16 %v888_v46  ;;  %v509_v61 = vunpack.c.h.bf16 %v888_v46  ;;  %v594_v41 = vld [vmem:[#allocation6 + $0x38] sm:$0xff]  }
  0x43   :  { %603 = vpow2.f32 %v266_v36  ;;  %v251_v52 = vsub.f32 0.0, %v235_v48  ;;  %v237_v56 = vand.u32 2147483647, %v505_v51  ;;  %v252_v59 = vsub.f32 0.0, %v236_v53 }
  0x44   :  { %605 = vpow2.f32 %v268_v40  ;;  %v274_v55 = vmul.f32 1.442695, %v250_v50  ;;  %v238_v4 = vand.u32 2147483647, %v508_v54  ;;  %v239_v19 = vand.u32 2147483647, %v509_v61 }
  0x45   :  { %546 = vmatpush3.bf16.msra.mxu0 %v590_v35  ;;  %607 = vpow2.f32 %v270_v44  ;;  %v276_v58 = vmul.f32 1.442695, %v251_v52  ;;  %v253_v14 = vsub.f32 0.0, %v237_v56  ;;  %v278_v15 = vmul.f32 1.442695, %v252_v59 }
  0x46   :  { %547 = vmatprep.subr.bf16.mxu0 %v760_v0  ;;  %609 = vpow2.f32 %v272_v47  ;;  %v512_v22 = vunpack.c.l.bf16 %v903_v9  ;;  %v254_v24 = vsub.f32 0.0, %v238_v4  ;;  %v513_v25 = vunpack.c.h.bf16 %v903_v9  ;;  %v921_v4 = vld [vmem:[#allocation3] sm:$0xf] }
  0x47   :  { %611 = vpow2.f32 %v274_v55  ;;  %v280_v33 = vmul.f32 1.442695, %v253_v14  ;;  %v255_v37 = vsub.f32 0.0, %v239_v19  ;;  %v210_v50 = vmax.f32 %v484_v2, 0.0 }
  0x48   :  { %613 = vpow2.f32 %v276_v58  ;;  %v240_v34 = vand.u32 2147483647, %v512_v22  ;;  %v241_v40 = vand.u32 2147483647, %v513_v25  ;;  %v282_v45 = vmul.f32 1.442695, %v254_v24 }
  0x49   :  { %v596_v57 = vpop.eup %595  ;;  %548 = vmatpush3.bf16.msra.mxu0 %v591_v49  ;;  %v211_v53 = vmax.f32 %v485_v3, 0.0  ;;  %v284_v56 = vmul.f32 1.442695, %v255_v37  ;;  %v212_v58 = vmax.f32 %v488_v6, 0.0  ;;  %v213_v3 = vmax.f32 %v489_v7, 0.0 }
  0x4a   :  { %v598_v62 = vpop.eup %597  ;;  %v290_v63 = vadd.f32 1.0, %v596_v57  ;;  %549 = vmatprep.subr.bf16.mxu0 %v760_v0  ;;  %v256_v47 = vsub.f32 0.0, %v240_v34  ;;  %v257_v48 = vsub.f32 0.0, %v241_v40  ;;  %v215_v19 = vmax.f32 %v493_v17, 0.0 }
  0x4b   :  { %v600_v10 = vpop.eup %599  ;;  %v291_v11 = vadd.f32 1.0, %v598_v62  ;;  %v217_v8 = vmax.f32 %v497_v29, 0.0 }
  0x4c   :  { %v602_v12 = vpop.eup %601  ;;  %615 = vlog2.f32 %v290_v63  ;;  %v292_v13 = vadd.f32 1.0, %v600_v10  ;;  %v288_v2 = vmul.f32 1.442695, %v257_v48 }
  0x4d   :  { %617 = vlog2.f32 %v291_v11  ;;  %v293_v18 = vadd.f32 1.0, %v602_v12  ;;  %550 = vmatpush3.bf16.msra.mxu0 %v592_v60  ;;  %v604_v23 = vpop.eup %603  ;;  %v286_v60 = vmul.f32 1.442695, %v256_v47  ;;  %v218_v47 = vmax.f32 %v500_v38, 0.0 }
  0x4e   :  { %619 = vlog2.f32 %v292_v13  ;;  %551 = vmatprep.subr.bf16.mxu0 %v760_v0  ;;  %v606_v26 = vpop.eup %605  ;;  %v294_v28 = vadd.f32 1.0, %v604_v23  ;;  %v214_v13 = vmax.f32 %v492_v16, 0.0  ;;  %v216_v16 = vmax.f32 %v496_v27, 0.0 }
  0x4f   :  { %621 = vlog2.f32 %v293_v18  ;;  %v608_v31 = vpop.eup %607  ;;  %v295_v32 = vadd.f32 1.0, %v606_v26 }
  0x50   :  { %623 = vpow2.f32 %v278_v15  ;;  %v610_v35 = vpop.eup %609  ;;  %v296_v36 = vadd.f32 1.0, %v608_v31 }
  0x51   :  { %625 = vlog2.f32 %v294_v28  ;;  %552 = vmatpush3.bf16.msra.mxu0 %v593_v21  ;;  %v297_v44 = vadd.f32 1.0, %v610_v35  ;;  %v612_v49 = vpop.eup %611 }
  0x52   :  { %627 = vlog2.f32 %v295_v32  ;;  %553 = vmatprep.subr.bf16.mxu0 %v760_v0  ;;  %v614_v52 = vpop.eup %613  ;;  %v298_v55 = vadd.f32 1.0, %v612_v49 }
  0x53   :  { %629 = vlog2.f32 %v296_v36  ;;  %v299_v59 = vadd.f32 1.0, %v614_v52 }
  0x54   :  { %631 = vlog2.f32 %v297_v44 }
  0x55   :  { %633 = vpow2.f32 %v280_v33  ;;  %554 = vmatpush3.bf16.msra.mxu0 %v594_v41 }
  0x56   :  { %v616_v57 = vpop.eup %615  ;;  %635 = vpow2.f32 %v282_v45 }
  0x57   :  { %v618_v62 = vpop.eup %617  ;;  %v307_v63 = vmul.f32 0.6931472, %v616_v57  ;;  %637 = vlog2.f32 %v298_v55  ;;  %v219_v55 = vmax.f32 %v501_v42, 0.0 }
  0x58   :  { %v620_v10 = vpop.eup %619  ;;  %v309_v1 = vmul.f32 0.6931472, %v618_v62  ;;  %639 = vlog2.f32 %v299_v59  ;;  %556 = vmatmul.mubr.bf16.vlgmr.msra.gmra.mrb[0].mxu0 %v921_v4 }
  0x59   :  { %v622_v11 = vpop.eup %621  ;;  %v338_v12 = vadd.f32 %v307_v63, %v210_v50  ;;  %v311_v6 = vmul.f32 0.6931472, %v620_v10  ;;  %641 = vpow2.f32 %v284_v56 }
  0x5a   :  { %v624_v14 = vpop.eup %623  ;;  %v339_v15 = vadd.f32 %v309_v1, %v211_v53  ;;  %v313_v18 = vmul.f32 0.6931472, %v622_v11  ;;  %643 = vpow2.f32 %v286_v60 }
  0x5b   :  { %v626_v21 = vpop.eup %625  ;;  %v354_v5 = vmul.f32 %v338_v12, %v338_v12  ;;  %v340_v7 = vadd.f32 %v311_v6, %v212_v58  ;;  %v300_v23 = vadd.f32 1.0, %v624_v14  ;;  %645 = vpow2.f32 %v288_v2 }
  0x5c   :  { %v628_v24 = vpop.eup %627  ;;  %v355_v26 = vmul.f32 %v339_v15, %v339_v15  ;;  %v341_v28 = vadd.f32 %v313_v18, %v213_v3  ;;  %v315_v31 = vmul.f32 0.6931472, %v626_v21 }
  0x5d   :  { %v630_v32 = vpop.eup %629  ;;  %v356_v33 = vmul.f32 %v340_v7, %v340_v7  ;;  %v317_v34 = vmul.f32 0.6931472, %v628_v24  ;;  %647 = vlog2.f32 %v300_v23  ;;  %v222_v23 = vmax.f32 %v508_v54, 0.0 }
  0x5e   :  { %v632_v17 = vpop.eup %631  ;;  %v370_v35 = vpack.c.bf16 %v355_v26, %v354_v5  ;;  %v357_v36 = vmul.f32 %v341_v28, %v341_v28  ;;  %v342_v37 = vadd.f32 %v315_v31, %v214_v13  ;;  %v319_v40 = vmul.f32 0.6931472, %v630_v32 }
  0x5f   :  { %v634_v41 = vpop.eup %633  ;;  %v343_v44 = vadd.f32 %v317_v34, %v215_v19  ;;  %v321_v45 = vmul.f32 0.6931472, %v632_v17  ;;  %v220_v13 = vmax.f32 %v504_v43, 0.0  ;;  %v221_v19 = vmax.f32 %v505_v51, 0.0 }
  0x60   :  { %v636_v48 = vpop.eup %635  ;;  %560 = vmatpush3.bf16.msra.mxu1 %v370_v35  ;;  %v371_v27 = vpack.c.bf16 %v357_v36, %v356_v33  ;;  %v358_v49 = vmul.f32 %v342_v37, %v342_v37  ;;  %v344_v50 = vadd.f32 %v319_v40, %v216_v16  ;;  %v301_v52 = vadd.f32 1.0, %v634_v41 }
  0x61   :  { %v638_v20 = vpop.eup %637  ;;  %561 = vmatprep.subr.bf16.mxu1 %v760_v0  ;;  %v359_v29 = vmul.f32 %v343_v44, %v343_v44  ;;  %v345_v53 = vadd.f32 %v321_v45, %v217_v8  ;;  %v302_v56 = vadd.f32 1.0, %v636_v48  ;;  %v223_v16 = vmax.f32 %v509_v61, 0.0 }
  0x62   :  { %v640_v57 = vpop.eup %639  ;;  %v323_v58 = vmul.f32 0.6931472, %v638_v20  ;;  %649 = vlog2.f32 %v301_v52  ;;  %v360_v38 = vmul.f32 %v344_v50, %v344_v50  ;;  %v224_v51 = vmax.f32 %v512_v22, 0.0  ;;  %v480_v20 = vld [vmem:[%s983_s4] ss:$0 sm:$0xff]  ;;  %s762_s4 = smov [#allocation9]  }
  0x63   :  { %v642_v59 = vpop.eup %641  ;;  %v361_v60 = vmul.f32 %v345_v53, %v345_v53  ;;  %v325_v62 = vmul.f32 0.6931472, %v640_v57  ;;  %651 = vlog2.f32 %v302_v56  ;;  %v372_v2 = vpack.c.bf16 %v359_v29, %v358_v49  ;;  %s462_s14 = sshll.u32 %s762_s4, 4  ;;  %s463_s14 = int_to_ptr.vmem [resolvable:$true] %s462_s14 }
  0x64   :  { %v644_v63 = vpop.eup %643  ;;  %562 = vmatpush3.bf16.msra.mxu1 %v371_v27  ;;  %v346_v10 = vadd.f32 %v323_v58, %v218_v47  ;;  %v303_v1 = vadd.f32 1.0, %v642_v59  ;;  %v225_v8 = vmax.f32 %v513_v25, 0.0  ;;  %v378_v41 = vunpack.c.l.bf16 %v921_v4  ;;  %s727_s15 = scalar_lea.vmem %s463_s14, 128  ;;  %p732_p11 = scmp.lt.s32.totalorder %s463_s14, %s463_s14 }
  0x65   :  { %v646_v3 = vpop.eup %645  ;;  %563 = vmatprep.subr.bf16.mxu1 %v760_v0  ;;  %v347_v11 = vadd.f32 %v325_v62, %v219_v55  ;;  %v304_v30 = vadd.f32 1.0, %v644_v63  ;;  %v373_v6 = vpack.c.bf16 %v361_v60, %v360_v38  ;;  %v452_v60 = vld [vmem:[%s984_s5] sm:$0xff]  ;;  %p728_p10 = scmp.ne.s32.totalorder %s463_s14, %s727_s15  ;;  %p733_p12 = scmp.lt.s32.totalorder %s727_s15, %s727_s15 }
  0x66   :  { %653 = vlog2.f32 %v303_v1  ;;  %v305_v42 = vadd.f32 1.0, %v646_v3  ;;  %v362_v14 = vmul.f32 %v346_v10, %v346_v10  ;;  %v379_v27 = vmul.f32 %v378_v41, %v378_v41 }
  0x67   :  { %v648_v12 = vpop.eup %647  ;;  %655 = vlog2.f32 %v304_v30  ;;  %v363_v15 = vmul.f32 %v347_v11, %v347_v11  ;;  %p734_p13 = por %p733_p12, %p732_p11 }
  0x68   :  { %564 = vmatpush3.bf16.msra.mxu1 %v372_v2  ;;  %v327_v18 = vmul.f32 0.6931472, %v648_v12  ;;  %657 = vlog2.f32 %v305_v42  ;;  %v380_v25 = vpack.c.bf16 %v379_v27, %v379_v27 }
  0x69   :  { %565 = vmatprep.subr.bf16.mxu1 %v760_v0  ;;  %v374_v7 = vpack.c.bf16 %v363_v15, %v362_v14  ;;  %p735_p0 = pnand %p734_p13, %p728_p10 }
  0x6a   :  { %v348_v21 = vadd.f32 %v327_v18, %v220_v13 }
  0x6c   :  { %v650_v5 = vpop.eup %649  ;;  %566 = vmatpush3.bf16.msra.mxu1 %v373_v6  ;;  %v364_v31 = vmul.f32 %v348_v21, %v348_v21 }
  0x6d   :  { %v652_v24 = vpop.eup %651  ;;  %567 = vmatprep.subr.bf16.mxu1 %v760_v0  ;;  %v329_v43 = vmul.f32 0.6931472, %v650_v5 }
  0x6e   :  { %v331_v26 = vmul.f32 0.6931472, %v652_v24 }
  0x6f   :  { %v349_v28 = vadd.f32 %v329_v43, %v221_v19 }
  0x70   :  { %v654_v32 = vpop.eup %653  ;;  %568 = vmatpush3.bf16.msra.mxu1 %v374_v7  ;;  %v350_v39 = vadd.f32 %v331_v26, %v222_v23 }
  0x71   :  { %v656_v33 = vpop.eup %655  ;;  %569 = vmatprep.subr.bf16.mxu1 %v760_v0  ;;  %v365_v54 = vmul.f32 %v349_v28, %v349_v28  ;;  %v333_v34 = vmul.f32 0.6931472, %v654_v32 }
  0x72   :  { %v658_v17 = vpop.eup %657  ;;  %v335_v35 = vmul.f32 0.6931472, %v656_v33  ;;  %v366_v46 = vmul.f32 %v350_v39, %v350_v39 }
  0x73   :  { %v375_v36 = vpack.c.bf16 %v365_v54, %v364_v31  ;;  %v351_v37 = vadd.f32 %v333_v34, %v223_v16  ;;  %v337_v61 = vmul.f32 0.6931472, %v658_v17 }
  0x74   :  { %v352_v40 = vadd.f32 %v335_v35, %v224_v51 }
  0x75   :  { %570 = vmatpush3.bf16.msra.mxu1 %v375_v36  ;;  %v367_v44 = vmul.f32 %v351_v37, %v351_v37  ;;  %v353_v22 = vadd.f32 %v337_v61, %v225_v8 }
  0x76   :  { %571 = vmatprep.subr.bf16.mxu1 %v760_v0  ;;  %v368_v45 = vmul.f32 %v352_v40, %v352_v40 }
  0x77   :  { %v376_v47 = vpack.c.bf16 %v367_v44, %v366_v46  ;;  %v369_v48 = vmul.f32 %v353_v22, %v353_v22 }
  0x79   :  { %572 = vmatpush3.bf16.msra.mxu1 %v376_v47  ;;  %v377_v9 = vpack.c.bf16 %v369_v48, %v368_v45 }
  0x7a   :  { %573 = vmatprep.subr.bf16.mxu1 %v760_v0  ;;  %v481_v0 = vld [vmem:[%s982_s3] ss:$0 sm:$0xff] }
  0x7d   :  { %574 = vmatpush3.bf16.msra.mxu1 %v377_v9 }
  0x80   :  { %576 = vmatmul.mubr.bf16.vlgmr.msra.gmra.mrb[0].mxu1 %v380_v25 }
 0x12b   :  { %v170_v49 = vpop.f32.mrb[0].mxu0 }
 0x12c   :  { %v557_v50 = vpop.f32.mrb[1].mxu0  ;;  %v451_v63 = vadd.f32 %v481_v0, %v170_v49 }
 0x12d   :  { %v173_v52 = vpop.f32.mrb[2].mxu0 }
 0x12e   :  { %v558_v4 = vpop.f32.mrb[3].mxu0 }
 0x153   :  { %v416_v29 = vpop.f32.mrb[0].mxu1 }
 0x154   :  { %v435_v53 = vadd.f32 %v480_v20, %v416_v29  ;;  %v577_v55 = vpop.f32.mrb[1].mxu1 }
 0x155   :  { %v419_v56 = vpop.f32.mrb[2].mxu1 }
 0x156   :  { %659 = vrsqrt.f32 %v435_v53  ;;  %v578_v57 = vpop.f32.mrb[3].mxu1  ;;  %vm438_vm1 = vcmp.eq.f32.partialorder %v435_v53, inf  ;;  %v441_v38 = vand.u32 2147483648, %v435_v53  ;;  %vm440_vm2 = vcmp.eq.f32.partialorder %v435_v53, 0.0 }
 0x160   :  { %v660_v58 = vpop.eup %659 }
 0x161   :  { %v437_v59 = vmul.f32 %v660_v58, %v435_v53 }
 0x163   :  { %v439_v62 = vsel %vm438_vm1, %v435_v53, %v437_v59 }
 0x164   :  { %v442_v2 = vsel %vm440_vm2, %v441_v38, %v439_v62 }
 0x165   :  { %v453_v10 = vmul.f32 %v452_v60, %v442_v2 }
 0x167   :  { %v454_v1 = vadd.f32 %v453_v10, %v451_v63 }
 0x169   :  { %455 = vst [vmem:[#allocation9] sm:$0xff] %v454_v1 }
 0x16a   :  { %738 = shalt.err (!%p735_p0)
}
 0x16b   :  { %s739_s5 = scalar_lea.hbm %s985_s6, 128 }
 0x16c   :  { %p740_p1 = scmp.ne.s32.totalorder %s985_s6, %s739_s5  ;;  %p743_p2 = scmp.lt.u32.totalorder %s739_s5, %s985_s6 }
 0x16e   :  { %p745_p3 = pnand %p743_p2, %p740_p1 }
 0x170   :  { %748 = shalt.err (!%p745_p3)
}
 0x171   :  { %465 = dma.vmem_to_hbm [thread:$0]  %s463_s14, 128, %s985_s6, [#allocation5]  }
 0x172   :  { %753 = dma.done.wait [#allocation5], 128  }
 0x173   :  { %754 = vsyncadd [#allocation5], 4294967168 }
 0x174   :  { %469 = vsyncpa [#allocation4], 1 }
 0x175   :  { %470 = vsyncpa [#allocation7], 1 }
 0x176   :  { %471 = vsyncpa [#allocation5], 1 }

</bundles_post_ra>
